<compile_context>
chip_gen: v7x
topology: tpu7x:2x2x1
jax: 0.10.0
libtpu: 0.0.40
codegen_flags: <defaults>
</compile_context>

<pallas_src>
import math
import functools

import jax
import jax.numpy as jnp
from jax.experimental import pallas as pl
from jax.experimental.pallas import tpu as pltpu


def mha_kernel(xq_ref, xk_ref, xv_ref,
               wq_ref, bq_ref, wk_ref, bk_ref, wv_ref, bv_ref,
               wo_ref, bo_ref, o_ref,
               k_scratch, v_scratch, *, num_heads, compute_dtype):
    cd = compute_dtype
    d_model = wq_ref.shape[0]
    d_k = d_model // num_heads

    t = pl.program_id(1)

    # ---- K/V projection: once per batch, reused across all q-tiles. -------
    @pl.when(t == 0)
    def _():
        xk = xk_ref[0]                                    # (n, d_model)
        xv = xv_ref[0]
        k = jnp.dot(xk, wk_ref[...],
                    preferred_element_type=jnp.float32) + bk_ref[...]
        v = jnp.dot(xv, wv_ref[...],
                    preferred_element_type=jnp.float32) + bv_ref[...]
        k = k.astype(cd)
        v = v.astype(cd)
        # Head-major layout in persistent VMEM scratch (split once per batch).
        for h in range(num_heads):
            k_scratch[h] = k[:, h * d_k:(h + 1) * d_k]
            v_scratch[h] = v[:, h * d_k:(h + 1) * d_k]

    # ---- Q projection: one lane-dense GEMM (scale pre-folded into W_Q). ---
    xq = xq_ref[0]                                        # (tm, d_model)
    q = jnp.dot(xq, wq_ref[...],
                preferred_element_type=jnp.float32) + bq_ref[...]
    q = q.astype(cd)
    qh = jnp.stack([q[:, h * d_k:(h + 1) * d_k] for h in range(num_heads)],
                   axis=0)                                # (H, tm, d_k)

    # ---- Attention scores: leading-batch trans_b contraction. -------------
    s = jnp.einsum('hmk,hnk->hmn', qh, k_scratch[...],
                   preferred_element_type=jnp.float32)    # (H, tm, n) f32

    # Numerically-stable softmax in f32; reciprocal rides the EUP slot.
    m = jnp.max(s, axis=-1, keepdims=True)
    e = jnp.exp(s - m)
    p = e * pl.reciprocal(jnp.sum(e, axis=-1, keepdims=True), approx=True)

    ho = jnp.einsum('hmn,hnk->hmk', p.astype(cd), v_scratch[...],
                    preferred_element_type=jnp.float32)   # (H, tm, d_k) f32

    # ---- Output projection: concat heads (lane axis) + one full-depth GEMM.
    ho_flat = jnp.concatenate([ho[h] for h in range(num_heads)],
                              axis=-1).astype(cd)         # (tm, d_model)
    out = jnp.dot(ho_flat, wo_ref[...],
                  preferred_element_type=jnp.float32) + bo_ref[...]

    o_ref[0] = out.astype(o_ref.dtype)


def multi_head_attention(Q, K, V, params, *, num_heads,
                         compute_dtype=jnp.float32, tile_m=256):
    B, n, d_model = Q.shape
    assert d_model % num_heads == 0, "d_model must be divisible by num_heads"
    d_k = d_model // num_heads
    wq, bq, wk, bk, wv, bv, wo, bo = params
    out_dtype = Q.dtype

    scale = 1.0 / math.sqrt(d_k)

    # Attention scale folded into the Q projection; cast matmul operands to
    # compute_dtype once in the wrapper (biases stay f32).
    wq_c = (wq * scale).astype(compute_dtype)
    bq_f = (bq * scale).astype(jnp.float32)
    wk_c = wk.astype(compute_dtype)
    wv_c = wv.astype(compute_dtype)
    wo_c = wo.astype(compute_dtype)
    bk_f = bk.astype(jnp.float32)
    bv_f = bv.astype(jnp.float32)
    bo_f = bo.astype(jnp.float32)

    Qc = Q.astype(compute_dtype)
    Kc = K.astype(compute_dtype)
    Vc = V.astype(compute_dtype)

    # Query tiling along the second ("arbitrary") grid axis; batch is parallel.
    tm = n if n < tile_m else tile_m
    assert n % tm == 0, "TODO(synk): pad ragged sequence lengths"
    num_q_tiles = n // tm

    kernel = functools.partial(mha_kernel, num_heads=num_heads,
                               compute_dtype=compute_dtype)

    q_spec = pl.BlockSpec((1, tm, d_model), lambda b, t: (b, t, 0))
    kv_spec = pl.BlockSpec((1, n, d_model), lambda b, t: (b, 0, 0))
    # Weight/bias block indices never change -> single-buffer them.
    w_spec = pl.BlockSpec((d_model, d_model), lambda b, t: (0, 0),
                          pipeline_mode=pl.Buffered(1))
    b_spec = pl.BlockSpec((1, d_model), lambda b, t: (0, 0),
                          pipeline_mode=pl.Buffered(1))
    o_spec = pl.BlockSpec((1, tm, d_model), lambda b, t: (b, t, 0))

    cd_size = jnp.dtype(compute_dtype).itemsize
    out_size = jnp.dtype(out_dtype).itemsize

    # Explicit VMEM budget (with headroom), capped at 64 MiB so it is safe on
    # every generation (v7x has 64 MiB physical per TensorCore).
    est_bytes = (
        2 * tm * d_model * cd_size            # Q blocks (double-buffered)
        + 2 * 2 * n * d_model * cd_size       # K, V blocks (double-buffered)
        + 4 * d_model * d_model * cd_size     # weights (single-buffered)
        + 4 * 2 * d_model * 4                 # biases
        + 2 * tm * d_model * out_size         # output blocks (double-buffered)
        + 2 * n * d_model * cd_size           # projected K/V scratch
        + 3 * num_heads * tm * n * 4          # f32 scores / softmax temps
        + 6 * tm * d_model * 4                # f32 projection / output temps
    )
    vmem_limit = int(min(max(2 * est_bytes, 32 * 2**20), 64 * 2**20))

    # Advisory cost: K/V projections counted once per batch (matches kernel).
    flops = B * (8 * n * d_model * d_model + 4 * n * n * d_model)
    transcendentals = B * num_heads * (n * n + n)
    bytes_accessed = (3 * B * n * d_model * cd_size
                      + B * n * d_model * out_size
                      + 4 * d_model * d_model * cd_size
                      + 4 * d_model * 4)

    return pl.pallas_call(
        kernel,
        out_shape=jax.ShapeDtypeStruct((B, n, d_model), out_dtype),
        grid_spec=pltpu.PrefetchScalarGridSpec(
            num_scalar_prefetch=0,
            grid=(B, num_q_tiles),
            in_specs=[q_spec, kv_spec, kv_spec,
                      w_spec, b_spec, w_spec, b_spec, w_spec, b_spec,
                      w_spec, b_spec],
            out_specs=o_spec,
            scratch_shapes=[pltpu.VMEM((num_heads, n, d_k), compute_dtype),
                            pltpu.VMEM((num_heads, n, d_k), compute_dtype)]),
        compiler_params=pltpu.CompilerParams(
            dimension_semantics=("parallel", "arbitrary"),
            vmem_limit_bytes=vmem_limit),
        cost_estimate=pl.CostEstimate(
            flops=int(flops),
            transcendentals=int(transcendentals),
            bytes_accessed=int(bytes_accessed)),
    )(Qc, Kc, Vc, wq_c, bq_f, wk_c, bk_f, wv_c, bv_f, wo_c, bo_f)


def reference_mha(Q, K, V, params, *, num_heads):
    # Pure-JAX reference mirroring the PyTorch forward.
    wq, bq, wk, bk, wv, bv, wo, bo = params
    B, n, d_model = Q.shape
    d_k = d_model // num_heads

    def proj(x, w, b):
        return x @ w + b[0]

    q = proj(Q, wq, bq).reshape(B, n, num_heads, d_k).transpose(0, 2, 1, 3)
    k = proj(K, wk, bk).reshape(B, n, num_heads, d_k).transpose(0, 2, 1, 3)
    v = proj(V, wv, bv).reshape(B, n, num_heads, d_k).transpose(0, 2, 1, 3)

    scores = jnp.einsum("bhqd,bhkd->bhqk", q, k) / math.sqrt(d_k)
    attn = jax.nn.softmax(scores, axis=-1)
    out = jnp.einsum("bhqk,bhkd->bhqd", attn, v)
    out = out.transpose(0, 2, 1, 3).reshape(B, n, d_model)
    return proj(out, wo, bo)


if __name__ == "__main__":
    B, n, d_model, num_heads = 2, 8, 32, 4

    key = jax.random.PRNGKey(0)
    keys = jax.random.split(key, 16)

    # Deterministic synthetic parameters (shapes from the module's __init__).
    init = 1.0 / math.sqrt(d_model)
    wq = jax.random.uniform(keys[0], (d_model, d_model), jnp.float32, -init, init)
    bq = jax.random.uniform(keys[1], (1, d_model), jnp.float32, -init, init)
    wk = jax.random.uniform(keys[2], (d_model, d_model), jnp.float32, -init, init)
    bk = jax.random.uniform(keys[3], (1, d_model), jnp.float32, -init, init)
    wv = jax.random.uniform(keys[4], (d_model, d_model), jnp.float32, -init, init)
    bv = jax.random.uniform(keys[5], (1, d_model), jnp.float32, -init, init)
    wo = jax.random.uniform(keys[6], (d_model, d_model), jnp.float32, -init, init)
    bo = jax.random.uniform(keys[7], (1, d_model), jnp.float32, -init, init)
    params = (wq, bq, wk, bk, wv, bv, wo, bo)

    Q = jax.random.normal(keys[8], (B, n, d_model), jnp.float32)
    K = jax.random.normal(keys[9], (B, n, d_model), jnp.float32)
    V = jax.random.normal(keys[10], (B, n, d_model), jnp.float32)

    ref = reference_mha(Q, K, V, params, num_heads=num_heads)

    # f32 path: tight correctness check against the pure-JAX reference.
    out = multi_head_attention(Q, K, V, params, num_heads=num_heads)
    out = jax.block_until_ready(out)
    assert out.shape == (B, n, d_model)
    assert jnp.allclose(out, ref, rtol=5e-3, atol=5e-3)

    # bf16 matmul path (f32 accumulation + f32 softmax): sanity check.
    out_bf16 = multi_head_attention(Q, K, V, params, num_heads=num_heads,
                                    compute_dtype=jnp.bfloat16)
    out_bf16 = jax.block_until_ready(out_bf16)
    assert out_bf16.shape == (B, n, d_model)
    assert float(jnp.max(jnp.abs(out_bf16.astype(jnp.float32) - ref))) < 0.25

    # Multi-q-tile path (exercises once-per-batch K/V projection reuse).
    n2 = 16
    Q2 = jax.random.normal(keys[11], (B, n2, d_model), jnp.float32)
    K2 = jax.random.normal(keys[12], (B, n2, d_model), jnp.float32)
    V2 = jax.random.normal(keys[13], (B, n2, d_model), jnp.float32)
    ref2 = reference_mha(Q2, K2, V2, params, num_heads=num_heads)
    out2 = multi_head_attention(Q2, K2, V2, params, num_heads=num_heads,
                                tile_m=8)
    out2 = jax.block_until_ready(out2)
    assert out2.shape == (B, n2, d_model)
    assert jnp.allclose(out2, ref2, rtol=5e-3, atol=5e-3)

    print("KERNEL_OK")
</pallas_src>

<mosaic_0001>
module attributes {stable_mosaic.version = 11 : i64} {
  func.func @mha_kernel(%arg0: i32, %arg1: i32, %arg2: memref<1x8x32xf32, #tpu.memory_space<vmem>>, %arg3: memref<1x8x32xf32, #tpu.memory_space<vmem>>, %arg4: memref<1x8x32xf32, #tpu.memory_space<vmem>>, %arg5: memref<32x32xf32, #tpu.memory_space<vmem>>, %arg6: memref<1x32xf32, #tpu.memory_space<vmem>>, %arg7: memref<32x32xf32, #tpu.memory_space<vmem>>, %arg8: memref<1x32xf32, #tpu.memory_space<vmem>>, %arg9: memref<32x32xf32, #tpu.memory_space<vmem>>, %arg10: memref<1x32xf32, #tpu.memory_space<vmem>>, %arg11: memref<32x32xf32, #tpu.memory_space<vmem>>, %arg12: memref<1x32xf32, #tpu.memory_space<vmem>>, %arg13: memref<1x8x32xf32, #tpu.memory_space<vmem>>, %arg14: memref<4x8x8xf32, #tpu.memory_space<vmem>>, %arg15: memref<4x8x8xf32, #tpu.memory_space<vmem>>) attributes {dimension_semantics = [#tpu.dimension_semantics<parallel>, #tpu.dimension_semantics<arbitrary>], iteration_bounds = array<i64: 2, 1>, scalar_prefetch = 0 : i64, scratch_operands = 2 : i64, tpu.core_type = #tpu.core_type<tc>, window_params = [{transform_indices = @transform_0, window_bounds = array<i64: 1, 8, 32>}, {transform_indices = @transform_1, window_bounds = array<i64: 1, 8, 32>}, {transform_indices = @transform_2, window_bounds = array<i64: 1, 8, 32>}, {pipeline_mode = #tpu.pipeline_mode<synchronous>, transform_indices = @transform_3, window_bounds = array<i64: 32, 32>}, {pipeline_mode = #tpu.pipeline_mode<synchronous>, transform_indices = @transform_4, window_bounds = array<i64: 1, 32>}, {pipeline_mode = #tpu.pipeline_mode<synchronous>, transform_indices = @transform_5, window_bounds = array<i64: 32, 32>}, {pipeline_mode = #tpu.pipeline_mode<synchronous>, transform_indices = @transform_6, window_bounds = array<i64: 1, 32>}, {pipeline_mode = #tpu.pipeline_mode<synchronous>, transform_indices = @transform_7, window_bounds = array<i64: 32, 32>}, {pipeline_mode = #tpu.pipeline_mode<synchronous>, transform_indices = @transform_8, window_bounds = array<i64: 1, 32>}, {pipeline_mode = #tpu.pipeline_mode<synchronous>, transform_indices = @transform_9, window_bounds = array<i64: 32, 32>}, {pipeline_mode = #tpu.pipeline_mode<synchronous>, transform_indices = @transform_10, window_bounds = array<i64: 1, 32>}, {transform_indices = @transform_11, window_bounds = array<i64: 1, 8, 32>}]} {
    %c0_i32 = arith.constant 0 : i32
    %0 = arith.cmpi eq, %arg1, %c0_i32 : i32
    %1 = arith.extui %0 : i1 to i32
    %c0_i32_0 = arith.constant 0 : i32
    %2 = arith.cmpi ne, %1, %c0_i32_0 : i32
    scf.if %2 {
      %c0_25 = arith.constant 0 : index
      %c0_26 = arith.constant 0 : index
      %c0_27 = arith.constant 0 : index
      %50 = vector.load %arg3[%c0_25, %c0_26, %c0_27] : memref<1x8x32xf32, #tpu.memory_space<vmem>>, vector<1x8x32xf32>
      %51 = vector.shape_cast %50 : vector<1x8x32xf32> to vector<8x32xf32>
      %c0_28 = arith.constant 0 : index
      %c0_29 = arith.constant 0 : index
      %c0_30 = arith.constant 0 : index
      %52 = vector.load %arg4[%c0_28, %c0_29, %c0_30] : memref<1x8x32xf32, #tpu.memory_space<vmem>>, vector<1x8x32xf32>
      %53 = vector.shape_cast %52 : vector<1x8x32xf32> to vector<8x32xf32>
      %c0_31 = arith.constant 0 : index
      %c0_32 = arith.constant 0 : index
      %54 = vector.load %arg7[%c0_31, %c0_32] : memref<32x32xf32, #tpu.memory_space<vmem>>, vector<32x32xf32>
      %cst_33 = arith.constant dense<0.000000e+00> : vector<8x32xf32>
      %55 = tpu.matmul %51, %54, %cst_33 {dimension_numbers = #tpu.dot_dimension_numbers<[1], [0], [0], [1], [0, 0, 1, 1], [], []>} : vector<8x32xf32>, vector<32x32xf32>, vector<8x32xf32> -> vector<8x32xf32>
      %c0_34 = arith.constant 0 : index
      %c0_35 = arith.constant 0 : index
      %56 = vector.load %arg8[%c0_34, %c0_35] : memref<1x32xf32, #tpu.memory_space<vmem>>, vector<1x32xf32>
      %57 = vector.broadcast %56 : vector<1x32xf32> to vector<8x32xf32>
      %58 = arith.addf %55, %57 : vector<8x32xf32>
      %c0_36 = arith.constant 0 : index
      %c0_37 = arith.constant 0 : index
      %59 = vector.load %arg9[%c0_36, %c0_37] : memref<32x32xf32, #tpu.memory_space<vmem>>, vector<32x32xf32>
      %cst_38 = arith.constant dense<0.000000e+00> : vector<8x32xf32>
      %60 = tpu.matmul %53, %59, %cst_38 {dimension_numbers = #tpu.dot_dimension_numbers<[1], [0], [0], [1], [0, 0, 1, 1], [], []>} : vector<8x32xf32>, vector<32x32xf32>, vector<8x32xf32> -> vector<8x32xf32>
      %c0_39 = arith.constant 0 : index
      %c0_40 = arith.constant 0 : index
      %61 = vector.load %arg10[%c0_39, %c0_40] : memref<1x32xf32, #tpu.memory_space<vmem>>, vector<1x32xf32>
      %62 = vector.broadcast %61 : vector<1x32xf32> to vector<8x32xf32>
      %63 = arith.addf %60, %62 : vector<8x32xf32>
      %64 = vector.extract_strided_slice %58 {offsets = [0, 0], sizes = [8, 8], strides = [1, 1]} : vector<8x32xf32> to vector<8x8xf32>
      %c0_41 = arith.constant 0 : index
      %c0_42 = arith.constant 0 : index
      %c0_43 = arith.constant 0 : index
      %65 = vector.load %arg14[%c0_41, %c0_42, %c0_43] : memref<4x8x8xf32, #tpu.memory_space<vmem>>, vector<1x8x8xf32>
      %66 = vector.shape_cast %65 : vector<1x8x8xf32> to vector<8x8xf32>
      %67 = vector.shape_cast %64 : vector<8x8xf32> to vector<1x8x8xf32>
      tpu.vector_store %arg14[%c0_41, %c0_42, %c0_43], %67 {strides = array<i32>} : memref<4x8x8xf32, #tpu.memory_space<vmem>>, vector<1x8x8xf32>,
      %68 = vector.extract_strided_slice %63 {offsets = [0, 0], sizes = [8, 8], strides = [1, 1]} : vector<8x32xf32> to vector<8x8xf32>
      %c0_44 = arith.constant 0 : index
      %c0_45 = arith.constant 0 : index
      %c0_46 = arith.constant 0 : index
      %69 = vector.load %arg15[%c0_44, %c0_45, %c0_46] : memref<4x8x8xf32, #tpu.memory_space<vmem>>, vector<1x8x8xf32>
      %70 = vector.shape_cast %69 : vector<1x8x8xf32> to vector<8x8xf32>
      %71 = vector.shape_cast %68 : vector<8x8xf32> to vector<1x8x8xf32>
      tpu.vector_store %arg15[%c0_44, %c0_45, %c0_46], %71 {strides = array<i32>} : memref<4x8x8xf32, #tpu.memory_space<vmem>>, vector<1x8x8xf32>,
      %72 = vector.extract_strided_slice %58 {offsets = [0, 8], sizes = [8, 8], strides = [1, 1]} : vector<8x32xf32> to vector<8x8xf32>
      %c1 = arith.constant 1 : index
      %c0_47 = arith.constant 0 : index
      %c0_48 = arith.constant 0 : index
      %73 = vector.load %arg14[%c1, %c0_47, %c0_48] : memref<4x8x8xf32, #tpu.memory_space<vmem>>, vector<1x8x8xf32>
      %74 = vector.shape_cast %73 : vector<1x8x8xf32> to vector<8x8xf32>
      %75 = vector.shape_cast %72 : vector<8x8xf32> to vector<1x8x8xf32>
      tpu.vector_store %arg14[%c1, %c0_47, %c0_48], %75 {strides = array<i32>} : memref<4x8x8xf32, #tpu.memory_space<vmem>>, vector<1x8x8xf32>,
      %76 = vector.extract_strided_slice %63 {offsets = [0, 8], sizes = [8, 8], strides = [1, 1]} : vector<8x32xf32> to vector<8x8xf32>
      %c1_49 = arith.constant 1 : index
      %c0_50 = arith.constant 0 : index
      %c0_51 = arith.constant 0 : index
      %77 = vector.load %arg15[%c1_49, %c0_50, %c0_51] : memref<4x8x8xf32, #tpu.memory_space<vmem>>, vector<1x8x8xf32>
      %78 = vector.shape_cast %77 : vector<1x8x8xf32> to vector<8x8xf32>
      %79 = vector.shape_cast %76 : vector<8x8xf32> to vector<1x8x8xf32>
      tpu.vector_store %arg15[%c1_49, %c0_50, %c0_51], %79 {strides = array<i32>} : memref<4x8x8xf32, #tpu.memory_space<vmem>>, vector<1x8x8xf32>,
      %80 = vector.extract_strided_slice %58 {offsets = [0, 16], sizes = [8, 8], strides = [1, 1]} : vector<8x32xf32> to vector<8x8xf32>
      %c2 = arith.constant 2 : index
      %c0_52 = arith.constant 0 : index
      %c0_53 = arith.constant 0 : index
      %81 = vector.load %arg14[%c2, %c0_52, %c0_53] : memref<4x8x8xf32, #tpu.memory_space<vmem>>, vector<1x8x8xf32>
      %82 = vector.shape_cast %81 : vector<1x8x8xf32> to vector<8x8xf32>
      %83 = vector.shape_cast %80 : vector<8x8xf32> to vector<1x8x8xf32>
      tpu.vector_store %arg14[%c2, %c0_52, %c0_53], %83 {strides = array<i32>} : memref<4x8x8xf32, #tpu.memory_space<vmem>>, vector<1x8x8xf32>,
      %84 = vector.extract_strided_slice %63 {offsets = [0, 16], sizes = [8, 8], strides = [1, 1]} : vector<8x32xf32> to vector<8x8xf32>
      %c2_54 = arith.constant 2 : index
      %c0_55 = arith.constant 0 : index
      %c0_56 = arith.constant 0 : index
      %85 = vector.load %arg15[%c2_54, %c0_55, %c0_56] : memref<4x8x8xf32, #tpu.memory_space<vmem>>, vector<1x8x8xf32>
      %86 = vector.shape_cast %85 : vector<1x8x8xf32> to vector<8x8xf32>
      %87 = vector.shape_cast %84 : vector<8x8xf32> to vector<1x8x8xf32>
      tpu.vector_store %arg15[%c2_54, %c0_55, %c0_56], %87 {strides = array<i32>} : memref<4x8x8xf32, #tpu.memory_space<vmem>>, vector<1x8x8xf32>,
      %88 = vector.extract_strided_slice %58 {offsets = [0, 24], sizes = [8, 8], strides = [1, 1]} : vector<8x32xf32> to vector<8x8xf32>
      %c3 = arith.constant 3 : index
      %c0_57 = arith.constant 0 : index
      %c0_58 = arith.constant 0 : index
      %89 = vector.load %arg14[%c3, %c0_57, %c0_58] : memref<4x8x8xf32, #tpu.memory_space<vmem>>, vector<1x8x8xf32>
      %90 = vector.shape_cast %89 : vector<1x8x8xf32> to vector<8x8xf32>
      %91 = vector.shape_cast %88 : vector<8x8xf32> to vector<1x8x8xf32>
      tpu.vector_store %arg14[%c3, %c0_57, %c0_58], %91 {strides = array<i32>} : memref<4x8x8xf32, #tpu.memory_space<vmem>>, vector<1x8x8xf32>,
      %92 = vector.extract_strided_slice %63 {offsets = [0, 24], sizes = [8, 8], strides = [1, 1]} : vector<8x32xf32> to vector<8x8xf32>
      %c3_59 = arith.constant 3 : index
      %c0_60 = arith.constant 0 : index
      %c0_61 = arith.constant 0 : index
      %93 = vector.load %arg15[%c3_59, %c0_60, %c0_61] : memref<4x8x8xf32, #tpu.memory_space<vmem>>, vector<1x8x8xf32>
      %94 = vector.shape_cast %93 : vector<1x8x8xf32> to vector<8x8xf32>
      %95 = vector.shape_cast %92 : vector<8x8xf32> to vector<1x8x8xf32>
      tpu.vector_store %arg15[%c3_59, %c0_60, %c0_61], %95 {strides = array<i32>} : memref<4x8x8xf32, #tpu.memory_space<vmem>>, vector<1x8x8xf32>,
    } else {
    }
    %c0 = arith.constant 0 : index
    %c0_1 = arith.constant 0 : index
    %c0_2 = arith.constant 0 : index
    %3 = vector.load %arg2[%c0, %c0_1, %c0_2] : memref<1x8x32xf32, #tpu.memory_space<vmem>>, vector<1x8x32xf32>
    %4 = vector.shape_cast %3 : vector<1x8x32xf32> to vector<8x32xf32>
    %c0_3 = arith.constant 0 : index
    %c0_4 = arith.constant 0 : index
    %5 = vector.load %arg5[%c0_3, %c0_4] : memref<32x32xf32, #tpu.memory_space<vmem>>, vector<32x32xf32>
    %cst = arith.constant dense<0.000000e+00> : vector<8x32xf32>
    %6 = tpu.matmul %4, %5, %cst {dimension_numbers = #tpu.dot_dimension_numbers<[1], [0], [0], [1], [0, 0, 1, 1], [], []>} : vector<8x32xf32>, vector<32x32xf32>, vector<8x32xf32> -> vector<8x32xf32>
    %c0_5 = arith.constant 0 : index
    %c0_6 = arith.constant 0 : index
    %7 = vector.load %arg6[%c0_5, %c0_6] : memref<1x32xf32, #tpu.memory_space<vmem>>, vector<1x32xf32>
    %8 = vector.broadcast %7 : vector<1x32xf32> to vector<8x32xf32>
    %9 = arith.addf %6, %8 : vector<8x32xf32>
    %10 = vector.extract_strided_slice %9 {offsets = [0, 0], sizes = [8, 8], strides = [1, 1]} : vector<8x32xf32> to vector<8x8xf32>
    %11 = vector.extract_strided_slice %9 {offsets = [0, 8], sizes = [8, 8], strides = [1, 1]} : vector<8x32xf32> to vector<8x8xf32>
    %12 = vector.extract_strided_slice %9 {offsets = [0, 16], sizes = [8, 8], strides = [1, 1]} : vector<8x32xf32> to vector<8x8xf32>
    %13 = vector.extract_strided_slice %9 {offsets = [0, 24], sizes = [8, 8], strides = [1, 1]} : vector<8x32xf32> to vector<8x8xf32>
    %14 = vector.shape_cast %10 : vector<8x8xf32> to vector<1x8x8xf32>
    %15 = vector.shape_cast %11 : vector<8x8xf32> to vector<1x8x8xf32>
    %16 = vector.shape_cast %12 : vector<8x8xf32> to vector<1x8x8xf32>
    %17 = vector.shape_cast %13 : vector<8x8xf32> to vector<1x8x8xf32>
    %18 = tpu.concatenate %14, %15, %16, %17 in 0 : vector<1x8x8xf32>, vector<1x8x8xf32>, vector<1x8x8xf32>, vector<1x8x8xf32> -> vector<4x8x8xf32>
    %c0_7 = arith.constant 0 : index
    %c0_8 = arith.constant 0 : index
    %c0_9 = arith.constant 0 : index
    %19 = vector.load %arg14[%c0_7, %c0_8, %c0_9] : memref<4x8x8xf32, #tpu.memory_space<vmem>>, vector<4x8x8xf32>
    "tpu.trace_start"() <{level = 10 : i32, message = "hmk,hnk->hmn"}> : () -> ()
    %cst_10 = arith.constant dense<0.000000e+00> : vector<4x8x8xf32>
    %20 = tpu.matmul %18, %19, %cst_10 {dimension_numbers = #tpu.dot_dimension_numbers<[2], [2], [1], [1], [0, 0, 0, 1, 1, 1], [0], [0]>} : vector<4x8x8xf32>, vector<4x8x8xf32>, vector<4x8x8xf32> -> vector<4x8x8xf32>
    "tpu.trace_stop"() : () -> ()
    %cst_11 = arith.constant dense<0xFF800000> : vector<4x8xf32>
    %21 = vector.multi_reduction <maximumf>, %20, %cst_11 [2] : vector<4x8x8xf32> to vector<4x8xf32>
    %22 = vector.shape_cast %21 : vector<4x8xf32> to vector<4x8x1xf32>
    %23 = vector.broadcast %22 : vector<4x8x1xf32> to vector<4x8x8xf32>
    %24 = arith.subf %20, %23 : vector<4x8x8xf32>
    %25 = math.exp %24 : vector<4x8x8xf32>
    %cst_12 = arith.constant dense<0.000000e+00> : vector<4x8xf32>
    %26 = vector.multi_reduction <add>, %25, %cst_12 [2] : vector<4x8x8xf32> to vector<4x8xf32>
    %27 = vector.shape_cast %26 : vector<4x8xf32> to vector<4x8x1xf32>
    %28 = tpu.reciprocal %27 {approx = true} : vector<4x8x1xf32> -> vector<4x8x1xf32>
    %29 = vector.broadcast %28 : vector<4x8x1xf32> to vector<4x8x8xf32>
    %30 = arith.mulf %25, %29 : vector<4x8x8xf32>
    %c0_13 = arith.constant 0 : index
    %c0_14 = arith.constant 0 : index
    %c0_15 = arith.constant 0 : index
    %31 = vector.load %arg15[%c0_13, %c0_14, %c0_15] : memref<4x8x8xf32, #tpu.memory_space<vmem>>, vector<4x8x8xf32>
    "tpu.trace_start"() <{level = 10 : i32, message = "hmn,hnk->hmk"}> : () -> ()
    %cst_16 = arith.constant dense<0.000000e+00> : vector<4x8x8xf32>
    %32 = tpu.matmul %30, %31, %cst_16 {dimension_numbers = #tpu.dot_dimension_numbers<[2], [1], [1], [2], [0, 0, 0, 1, 1, 2], [0], [0]>} : vector<4x8x8xf32>, vector<4x8x8xf32>, vector<4x8x8xf32> -> vector<4x8x8xf32>
    "tpu.trace_stop"() : () -> ()
    %33 = vector.extract_strided_slice %32 {offsets = [0, 0, 0], sizes = [1, 8, 8], strides = [1, 1, 1]} : vector<4x8x8xf32> to vector<1x8x8xf32>
    %34 = vector.shape_cast %33 : vector<1x8x8xf32> to vector<8x8xf32>
    %35 = vector.extract_strided_slice %32 {offsets = [1, 0, 0], sizes = [1, 8, 8], strides = [1, 1, 1]} : vector<4x8x8xf32> to vector<1x8x8xf32>
    %36 = vector.shape_cast %35 : vector<1x8x8xf32> to vector<8x8xf32>
    %37 = vector.extract_strided_slice %32 {offsets = [2, 0, 0], sizes = [1, 8, 8], strides = [1, 1, 1]} : vector<4x8x8xf32> to vector<1x8x8xf32>
    %38 = vector.shape_cast %37 : vector<1x8x8xf32> to vector<8x8xf32>
    %39 = vector.extract_strided_slice %32 {offsets = [3, 0, 0], sizes = [1, 8, 8], strides = [1, 1, 1]} : vector<4x8x8xf32> to vector<1x8x8xf32>
    %40 = vector.shape_cast %39 : vector<1x8x8xf32> to vector<8x8xf32>
    %41 = tpu.concatenate %34, %36, %38, %40 in 1 : vector<8x8xf32>, vector<8x8xf32>, vector<8x8xf32>, vector<8x8xf32> -> vector<8x32xf32>
    %c0_17 = arith.constant 0 : index
    %c0_18 = arith.constant 0 : index
    %42 = vector.load %arg11[%c0_17, %c0_18] : memref<32x32xf32, #tpu.memory_space<vmem>>, vector<32x32xf32>
    %cst_19 = arith.constant dense<0.000000e+00> : vector<8x32xf32>
    %43 = tpu.matmul %41, %42, %cst_19 {dimension_numbers = #tpu.dot_dimension_numbers<[1], [0], [0], [1], [0, 0, 1, 1], [], []>} : vector<8x32xf32>, vector<32x32xf32>, vector<8x32xf32> -> vector<8x32xf32>
    %c0_20 = arith.constant 0 : index
    %c0_21 = arith.constant 0 : index
    %44 = vector.load %arg12[%c0_20, %c0_21] : memref<1x32xf32, #tpu.memory_space<vmem>>, vector<1x32xf32>
    %45 = vector.broadcast %44 : vector<1x32xf32> to vector<8x32xf32>
    %46 = arith.addf %43, %45 : vector<8x32xf32>
    %c0_22 = arith.constant 0 : index
    %c0_23 = arith.constant 0 : index
    %c0_24 = arith.constant 0 : index
    %47 = vector.load %arg13[%c0_22, %c0_23, %c0_24] : memref<1x8x32xf32, #tpu.memory_space<vmem>>, vector<1x8x32xf32>
    %48 = vector.shape_cast %47 : vector<1x8x32xf32> to vector<8x32xf32>
    %49 = vector.shape_cast %46 : vector<8x32xf32> to vector<1x8x32xf32>
    tpu.vector_store %arg13[%c0_22, %c0_23, %c0_24], %49 {strides = array<i32>} : memref<1x8x32xf32, #tpu.memory_space<vmem>>, vector<1x8x32xf32>,
    return
  }
  func.func @transform_0(%arg0: i32, %arg1: i32) -> (i32, i32, i32) {
    %c0_i32 = arith.constant 0 : i32
    %c0_i32_0 = arith.constant 0 : i32
    return %arg0, %arg1, %c0_i32 : i32, i32, i32
  }
  func.func @transform_1(%arg0: i32, %arg1: i32) -> (i32, i32, i32) {
    %c0_i32 = arith.constant 0 : i32
    %c0_i32_0 = arith.constant 0 : i32
    %c0_i32_1 = arith.constant 0 : i32
    return %arg0, %c0_i32, %c0_i32_0 : i32, i32, i32
  }
  func.func @transform_2(%arg0: i32, %arg1: i32) -> (i32, i32, i32) {
    %c0_i32 = arith.constant 0 : i32
    %c0_i32_0 = arith.constant 0 : i32
    %c0_i32_1 = arith.constant 0 : i32
    return %arg0, %c0_i32, %c0_i32_0 : i32, i32, i32
  }
  func.func @transform_3(%arg0: i32, %arg1: i32) -> (i32, i32) {
    %c0_i32 = arith.constant 0 : i32
    %c0_i32_0 = arith.constant 0 : i32
    %c0_i32_1 = arith.constant 0 : i32
    return %c0_i32, %c0_i32_0 : i32, i32
  }
  func.func @transform_4(%arg0: i32, %arg1: i32) -> (i32, i32) {
    %c0_i32 = arith.constant 0 : i32
    %c0_i32_0 = arith.constant 0 : i32
    %c0_i32_1 = arith.constant 0 : i32
    return %c0_i32, %c0_i32_0 : i32, i32
  }
  func.func @transform_5(%arg0: i32, %arg1: i32) -> (i32, i32) {
    %c0_i32 = arith.constant 0 : i32
    %c0_i32_0 = arith.constant 0 : i32
    %c0_i32_1 = arith.constant 0 : i32
    return %c0_i32, %c0_i32_0 : i32, i32
  }
  func.func @transform_6(%arg0: i32, %arg1: i32) -> (i32, i32) {
    %c0_i32 = arith.constant 0 : i32
    %c0_i32_0 = arith.constant 0 : i32
    %c0_i32_1 = arith.constant 0 : i32
    return %c0_i32, %c0_i32_0 : i32, i32
  }
  func.func @transform_7(%arg0: i32, %arg1: i32) -> (i32, i32) {
    %c0_i32 = arith.constant 0 : i32
    %c0_i32_0 = arith.constant 0 : i32
    %c0_i32_1 = arith.constant 0 : i32
    return %c0_i32, %c0_i32_0 : i32, i32
  }
  func.func @transform_8(%arg0: i32, %arg1: i32) -> (i32, i32) {
    %c0_i32 = arith.constant 0 : i32
    %c0_i32_0 = arith.constant 0 : i32
    %c0_i32_1 = arith.constant 0 : i32
    return %c0_i32, %c0_i32_0 : i32, i32
  }
  func.func @transform_9(%arg0: i32, %arg1: i32) -> (i32, i32) {
    %c0_i32 = arith.constant 0 : i32
    %c0_i32_0 = arith.constant 0 : i32
    %c0_i32_1 = arith.constant 0 : i32
    return %c0_i32, %c0_i32_0 : i32, i32
  }
  func.func @transform_10(%arg0: i32, %arg1: i32) -> (i32, i32) {
    %c0_i32 = arith.constant 0 : i32
    %c0_i32_0 = arith.constant 0 : i32
    %c0_i32_1 = arith.constant 0 : i32
    return %c0_i32, %c0_i32_0 : i32, i32
  }
  func.func @transform_11(%arg0: i32, %arg1: i32) -> (i32, i32, i32) {
    %c0_i32 = arith.constant 0 : i32
    %c0_i32_0 = arith.constant 0 : i32
    return %arg0, %arg1, %c0_i32 : i32, i32, i32
  }
}

</mosaic_0001>

<bundles_post_ra>
// kernel: tpu_custom_call.1
= control target key start
LH: loop header
LB: loop body
LE: loop exit
PB: predicated region body
PF: predicated region fallthrough
CT: control target
= control target key end

     0   :  { %s2973_s0 = inlined_call_operand.hbm [shape: f32[2,8,32], index: 0, kind: input, shape index: {}]   ;;  %s2974_s1 = inlined_call_operand.hbm [shape: f32[2,8,32], index: 1, kind: input, shape index: {}]   ;;  %s2975_s2 = inlined_call_operand.hbm [shape: f32[2,8,32], index: 2, kind: input, shape index: {}]   ;;  %s2976_s3 = inlined_call_operand.hbm [shape: f32[32,32], index: 3, kind: input, shape index: {}]   ;;  %s2977_s4 = inlined_call_operand.vmem [shape: f32[1,32], index: 4, kind: input, shape index: {}]   ;;  %s2978_s5 = inlined_call_operand.hbm [shape: f32[32,32], index: 5, kind: input, shape index: {}]   ;;  %s2979_s6 = inlined_call_operand.vmem [shape: f32[1,32], index: 6, kind: input, shape index: {}]   ;;  %s2980_s7 = inlined_call_operand.hbm [shape: f32[32,32], index: 7, kind: input, shape index: {}]   ;;  %s2981_s8 = inlined_call_operand.hbm [shape: f32[1,32], index: 8, kind: input, shape index: {}]   ;;  %s2982_s9 = inlined_call_operand.vmem [shape: f32[32,32], index: 9, kind: input, shape index: {}]   ;;  %s2983_s10 = inlined_call_operand.vmem [shape: f32[1,32], index: 10, kind: input, shape index: {}]   ;;  %s2984_s11 = inlined_call_operand.hbm [shape: f32[2,8,32], index: 11, kind: output, shape index: {}]  }
   0x1   :  { %3010 = sst [smem:[#allocation30_spill]] %s2974_s1 }
   0x2   :  { %3011 = sst [smem:[#allocation31_spill]] %s2976_s3 }
   0x3   :  { %3012 = sst [smem:[#allocation32_spill]] %s2980_s7 }
   0x4   :  { %3013 = sst [smem:[#allocation33_spill]] %s2982_s9 }
   0x5   :  { %3014 = sst [smem:[#allocation34_spill]] %s2983_s10 }
   0x6   :  { %3015 = sst [smem:[#allocation35_spill]] %s2984_s11 }
   0x7   :  { %16 = vsyncpa [#allocation5], 0 }
   0x8   :  { %18 = vsyncpa [#allocation5 + $0x1], 0 }
   0x9   :  { %19 = vsyncpa [#allocation8], 0 }
   0xa   :  { %21 = vsyncpa [#allocation8 + $0x1], 0 }
   0xb   :  { %22 = vsyncpa [#allocation11], 0 }
   0xc   :  { %23 = vsyncpa [#allocation14], 0 }
   0xd   :  { %24 = vsyncpa [#allocation6], 0 }
   0xe   :  { %26 = vsyncpa [#allocation6 + $0x1], 0  ;;  %s2480_s17 = smov 0   ;;  %s2482_s18 = smov 0  }
   0xf   :  { %s2484_s19 = smov 0   ;;  %s2486_s20 = smov 0  }
  0x10   :  { %s2488_s21 = smov 0   ;;  %s2490_s22 = smov 0  }
  0x11 LB: > { %3016 = sst [smem:[#allocation22_spill]] %s2379_s17  ;;  %s2511_s23 = sadd.s32 4294967295, %s2399_s22   ;;  %s2399_s22 = sphi %s2490_s22, %s32_s22   ;;  %s2395_s21 = sphi %s2488_s21, %s3063_s21   ;;  %s2391_s20 = sphi %s2486_s20, %s3062_s20   ;;  %s2387_s19 = sphi %s2484_s19, %s3066_s19   ;;  %s2383_s18 = sphi %s2482_s18, %s3065_s18   ;;  %s2379_s17 = sphi %s2480_s17, %s3064_s17  }
  0x12   : > { %3017 = sst [smem:[#allocation23_spill]] %s2391_s20  ;;  %p1774_p0 = scmp.ge.s32.totalorder %s2399_s22, 1 }
  0x13   : > { %3018 = sst [smem:[#allocation24_spill]] %s2395_s21  ;;  %p2994_p1 = scmp.eq.s32.totalorder %s2511_s23, 0 }
  0x14   : > { %3019 = sst [smem:[#allocation25_spill]] %s2399_s22  ;;  %p325_p2 = scmp.lt.s32.totalorder %s2399_s22, 3 }
  0x15   : > { %s2401_s25 = smov [#allocation10]   ;;  %s2402_s28 = smov [#allocation13]  }
  0x16   : > { %p2516_p3 = pnand %p1774_p0, %p325_p2  ;;  %s337_s26 = sshll.u32 %s2401_s25, 4  ;;  %s2520_s26 = int_to_ptr.vmem [resolvable:$true] %s337_s26 }
  0x17   : > { %s369_s29 = sshll.u32 %s2402_s28, 4  ;;  %s3022_s3 = sld [smem:[#allocation31_spill]]  ;;  %s2531_s29 = int_to_ptr.vmem [resolvable:$true] %s369_s29 }
  0x18   : > { %s3020_s24 = scalar_select %p2516_p3, 1, 0 }
  0x19   : > { %p1987_p4 = pneg %p2516_p3 }
  0x1b   : > { %p2527_p6 = pnand %p1987_p4, %p2994_p1 }
  0x1d   : > { %s3021_s27 = scalar_select %p2527_p6, 1, 0 }
  0x1e   : > { %s2103_s13 = scalar_lea.hbm %s3022_s3, 512  ;;  %p2541_p8 = pneg %p2527_p6 }
  0x1f   : > { %p2104_p7 = scmp.ne.s32.totalorder %s3022_s3, %s2103_s13  ;;  %p2110_p11 = scmp.lt.u32.totalorder %s2103_s13, %s3022_s3 }
  0x20   : > { %s3023_s16 = scalar_select %p2541_p8, 1, 0 }
  0x21   : > { %p2106_p9 = pnand %p2541_p8, %p2104_p7 }
  0x23   : > { %p2107_p10 = pneg %p2106_p9 }
  0x25   : > { %p2112_p12 = pnand %p2110_p11, %p2107_p10 }
  0x27   : > { %2115 = shalt.err (!%p2112_p12)
}
  0x28   : > { %s2116_s30 = scalar_lea.vmem %s2520_s26, 512  ;;  %p2124_p4 = scmp.lt.s32.totalorder %s2520_s26, %s2520_s26 }
  0x29   : > { %p2117_p13 = scmp.ne.s32.totalorder %s2520_s26, %s2116_s30  ;;  %p2125_p5 = scmp.lt.s32.totalorder %s2116_s30, %s2116_s30 }
  0x2b   : > { %p2119_p0 = pnand %p2117_p13, %p2541_p8  ;;  %p2126_p7 = por %p2125_p5, %p2124_p4 }
  0x2d   : > { %p2120_p2 = pneg %p2119_p0 }
  0x2f   : > { %p2127_p9 = pnand %p2126_p7, %p2120_p2 }
  0x31   : > { %2130 = shalt.err (!%p2127_p9)
}
  0x32   : > { %s2987_s12 = smov 128   ;;  %s2988_s13 = smov 8  }
  0x33   : > { %1990 = dma.hbm_to_vmem [thread:$0]  (!%p2527_p6), %s3022_s3, 512, %s2520_s26, [#allocation11], %s2987_s12, %s2987_s12, %s2988_s13  }
  0x34   : > { %s3024_s7 = sld [smem:[#allocation32_spill]] }
  0x3a   : > { %s2131_s30 = scalar_lea.hbm %s3024_s7, 512 }
  0x3b   : > { %p2132_p5 = scmp.ne.s32.totalorder %s3024_s7, %s2131_s30  ;;  %p2138_p12 = scmp.lt.u32.totalorder %s2131_s30, %s3024_s7 }
  0x3d   : > { %p2134_p10 = pnand %p2132_p5, %p2541_p8 }
  0x3f   : > { %p2135_p11 = pneg %p2134_p10 }
  0x41   : > { %p2140_p13 = pnand %p2138_p12, %p2135_p11 }
  0x43   : > { %2143 = shalt.err (!%p2140_p13)
}
  0x44   : > { %s2144_s26 = scalar_lea.vmem %s2531_s29, 512  ;;  %p2152_p7 = scmp.lt.s32.totalorder %s2531_s29, %s2531_s29 }
  0x45   : > { %p2145_p0 = scmp.ne.s32.totalorder %s2531_s29, %s2144_s26  ;;  %p2153_p9 = scmp.lt.s32.totalorder %s2144_s26, %s2144_s26 }
  0x47   : > { %p2147_p2 = pnand %p2145_p0, %p2541_p8  ;;  %p2154_p5 = por %p2153_p9, %p2152_p7 }
  0x49   : > { %p2148_p4 = pneg %p2147_p2 }
  0x4b   : > { %p2155_p10 = pnand %p2154_p5, %p2148_p4 }
  0x4d   : > { %2158 = shalt.err (!%p2155_p10)
}
  0x4e   : > { %1996 = dma.hbm_to_vmem [thread:$0]  (!%p2527_p6), %s3024_s7, 512, %s2531_s29, [#allocation14], %s2987_s12, %s2987_s12, %s2988_s13  }
  0x4f   : > { %s1773_s11 = sadd.s32 4294967294, %s2399_s22   ;;  %s44_s20 = sadd.s32 1, %s2395_s21 }
  0x50   : > { %p46_p11 = scmp.ge.s32.totalorder %s44_s20, 2  ;;  %s53_s14 = sadd.s32 1, %s2387_s19 }
  0x51   : > { %p60_p12 = scmp.ne.s32.totalorder %s2387_s19, %s2383_s18  ;;  %p61_p13 = scmp.eq.s32.totalorder %s2399_s22, 0 }
  0x52   : > { %s3068_s20 = smov (%p46_p11, %s44_s20), 0  ;;  %p66_p2 = scmp.ne.s32.totalorder %s2383_s18, %s2379_s17 }
  0x53   : > { %3025 = sst [smem:[#allocation26_spill]] %s3068_s20  ;;  %p2599_p0 = por %p61_p13, %p60_p12 }
  0x54   : > { %s48_s29 = ssub.s32 %s2395_s21, %s3068_s20  ;;  %p312_p4 = scmp.eq.s32.totalorder %s2511_s23, 1 }
  0x55   : > { %p51_p7 = scmp.eq.s32.totalorder %s48_s29, 0  ;;  %p2610_p9 = por %p2994_p1, %p66_p2 }
  0x56   : > { %p2614_p5 = por %p312_p4, %p60_p12  ;;  %p318_p10 = scmp.eq.s32.totalorder %s1773_s11, 1 }
  0x57   : > { %s3027_s25 = scalar_select %p2610_p9, 1, 0 }
  0x58   : > { %s3028_s28 = scalar_select %p2614_p5, 1, 0 }
  0x59   : > { %s2619_s30 = scalar_select %p51_p7, %s2387_s19, %s53_s14  }
  0x5a   : > { %3029 = sst [smem:[#allocation27_spill]] %s3028_s28  ;;  %p2621_p11 = por %p318_p10, %p66_p2 }
  0x5b   : > { %3030 = sst [smem:[#allocation28_spill]] %s2619_s30  ;;  %p2018_p13 = scmp.lt.s32.totalorder %s2399_s22, 2 }
  0x5c   : > { %s3031_s26 = scalar_select %p2621_p11, 1, 0 }
  0x5d   : > { %s2989_s9 = sand.u32 1, %s2387_s19   ;;  %s2628_s10 = sshll.u32 %s2395_s21, 7 }
  0x5e   : > { %3032 = sst [smem:[#allocation29_spill]] %s3031_s26  ;;  %s2632_s29 = sshll.u32 %s2989_s9, 3 }
  0x5f   : > { %p2636_p12 = pnand %p2018_p13, %p2599_p0  ;;  %s419_s11 = sand.u32 1, %s2399_s22  }
  0x60   : > { %s3034_s1 = sld [smem:[#allocation30_spill]]  ;;  %s423_s7 = scalar_lea.vmem [#allocation7], %s2632_s29 }
  0x61   : > { %s3033_s12 = scalar_select %p2636_p12, 1, 0 }
  0x62   : > { %s430_s9 = sshll.u32 %s423_s7, 4  ;;  %s2650_s15 = scalar_lea.sflag [#allocation8], %s419_s11  ;;  %s2648_s9 = int_to_ptr.vmem [resolvable:$true] %s430_s9 }
  0x63   : > { %p2656_p2 = pneg %p2636_p12 }
  0x65   : > { %s3035_s21 = scalar_select %p2656_p2, 1, 0 }
  0x66   : > { %s2645_s3 = scalar_lea.hbm %s3034_s1, %s2628_s10  ;;  %s2164_s30 = scalar_lea.hbm %s3034_s1, 256 }
  0x67   : > { %s2159_s20 = scalar_lea.hbm %s2645_s3, 128  ;;  %p2165_p10 = scmp.lt.u32.totalorder %s2645_s3, %s3034_s1 }
  0x68   : > { %p2160_p0 = scmp.ne.s32.totalorder %s2645_s3, %s2159_s20  ;;  %p2166_p13 = scmp.lt.u32.totalorder %s2164_s30, %s2159_s20 }
  0x69   : > { %p2168_p11 = scmp.lt.u32.totalorder %s2159_s20, %s2645_s3 }
  0x6a   : > { %p2162_p4 = pnand %p2656_p2, %p2160_p0  ;;  %p2167_p1 = por %p2166_p13, %p2165_p10 }
  0x6c   : > { %p2163_p7 = pneg %p2162_p4  ;;  %p2169_p5 = por %p2168_p11, %p2167_p1 }
  0x6e   : > { %p2170_p9 = pnand %p2169_p5, %p2163_p7 }
  0x70   : > { %2173 = shalt.err (!%p2170_p9)
}
  0x71   : > { %s2174_s11 = scalar_lea.vmem %s2648_s9, 128  ;;  %s2405_s13 = smov [#allocation7]  }
  0x72   : > { %p2175_p0 = scmp.ne.s32.totalorder %s2648_s9, %s2174_s11  ;;  %s2179_s14 = sshll.u32 %s2405_s13, 4  ;;  %s2180_s14 = int_to_ptr.vmem [resolvable:$false] %s2179_s14 }
  0x73   : > { %s2181_s22 = scalar_lea.vmem %s2180_s14, 256  ;;  %p2182_p6 = scmp.lt.s32.totalorder %s2648_s9, %s2180_s14 }
  0x74   : > { %p2177_p4 = pnand %p2175_p0, %p2656_p2  ;;  %p2183_p8 = scmp.lt.s32.totalorder %s2181_s22, %s2174_s11 }
  0x76   : > { %p2178_p3 = pneg %p2177_p4  ;;  %p2184_p10 = por %p2183_p8, %p2182_p6 }
  0x78   : > { %p2185_p13 = pnand %p2184_p10, %p2178_p3 }
  0x7a   : > { %2188 = shalt.err (!%p2185_p13)
}
  0x7b   : > { %2006 = dma.hbm_to_vmem [thread:$0]  (!%p2636_p12), %s2645_s3, 128, %s2648_s9, %s2650_s15  }
  0x7c   : > { %s2406_s20 = smov [#allocation12]   ;;  %s2407_s7 = smov [#allocation15]  }
  0x7d   : > { %s353_s30 = sshll.u32 %s2406_s20, 4  ;;  %s383_s1 = sshll.u32 %s2407_s7, 4  ;;  %s354_s30 = int_to_ptr.vmem [resolvable:$true] %s353_s30  ;;  %s384_s1 = int_to_ptr.vmem [resolvable:$true] %s383_s1 }
  0x7e   : > { %s2189_s14 = scalar_lea.hbm %s2978_s5, 512  ;;  %p3036_p3 = scmp.ne.s32.totalorder %s3023_s16, 0 }
  0x7f   : > { %p2190_p1 = scmp.ne.s32.totalorder %s2978_s5, %s2189_s14  ;;  %p2196_p9 = scmp.lt.u32.totalorder %s2189_s14, %s2978_s5 }
  0x81   : > { %p2192_p6 = pnand %p2190_p1, %p3036_p3 }
  0x83   : > { %p2193_p8 = pneg %p2192_p6 }
  0x85   : > { %p2198_p5 = pnand %p2196_p9, %p2193_p8 }
  0x87   : > { %2201 = shalt.err (!%p2198_p5)
}
  0x88   : > { %s2202_s3 = scalar_lea.vmem %s354_s30, 512  ;;  %p2210_p4 = scmp.lt.s32.totalorder %s354_s30, %s354_s30 }
  0x89   : > { %p2203_p11 = scmp.ne.s32.totalorder %s354_s30, %s2202_s3  ;;  %p2211_p10 = scmp.lt.s32.totalorder %s2202_s3, %s2202_s3 }
  0x8b   : > { %p2205_p7 = pnand %p2203_p11, %p3036_p3  ;;  %p2212_p13 = por %p2211_p10, %p2210_p4 }
  0x8d   : > { %p2206_p0 = pneg %p2205_p7 }
  0x8f   : > { %p2213_p12 = pnand %p2212_p13, %p2206_p0 }
  0x91   : > { %2216 = shalt.err (!%p2213_p12)
}
  0x92   : > { %p3037_p1 = scmp.ne.s32.totalorder %s3021_s27, 0  ;;  %s3038_s26 = smov 8  }
  0x93   : > { %s3039_s9 = smov 128   ;;  %s2217_s13 = scalar_lea.hbm %s2981_s8, 16 }
  0x94   : > { %1993 = dma.hbm_to_vmem [thread:$0]  (!%p3037_p1), %s2978_s5, 512, %s354_s30, [#allocation11], %s3039_s9, %s3039_s9, %s3038_s26  }
  0x95   : > { %p2218_p6 = scmp.ne.s32.totalorder %s2981_s8, %s2217_s13  ;;  %p2224_p9 = scmp.lt.u32.totalorder %s2217_s13, %s2981_s8 }
  0x97   : > { %p2220_p12 = pnand %p2218_p6, %p3036_p3 }
  0x99   : > { %p2221_p8 = pneg %p2220_p12 }
  0x9b   : > { %p2226_p5 = pnand %p2224_p9, %p2221_p8 }
  0x9d   : > { %2229 = shalt.err (!%p2226_p5)
}
  0x9e   : > { %s2230_s17 = scalar_lea.vmem %s384_s1, 16  ;;  %s2237_s30 = scalar_lea.vmem %s384_s1, 32 }
  0x9f   : > { %p2231_p11 = scmp.ne.s32.totalorder %s384_s1, %s2230_s17  ;;  %p2238_p4 = scmp.lt.s32.totalorder %s384_s1, %s384_s1 }
  0xa0   : > { %p2239_p10 = scmp.lt.s32.totalorder %s2237_s30, %s2230_s17 }
  0xa1   : > { %p2233_p7 = pnand %p2231_p11, %p3036_p3 }
  0xa2   : > { %p2240_p13 = por %p2239_p10, %p2238_p4 }
  0xa3   : > { %p2234_p0 = pneg %p2233_p7 }
  0xa5   : > { %p2241_p2 = pnand %p2240_p13, %p2234_p0 }
  0xa7   : > { %2244 = shalt.err (!%p2241_p2)
}
  0xa8   : > { %1999 = dma.hbm_to_vmem [thread:$0]  (!%p3037_p1), %s2981_s8, 16, %s384_s1, [#allocation14]  }
  0xa9   : > { %s2723_s20 = scalar_lea.hbm %s2973_s0, %s2628_s10  ;;  %s404_s7 = scalar_lea.vmem [#allocation4], %s2632_s29 }
  0xaa   : > { %s412_s27 = sshll.u32 %s404_s7, 4  ;;  %s2732_s11 = scalar_lea.hbm %s2975_s2, %s2628_s10  ;;  %s2726_s27 = int_to_ptr.vmem [resolvable:$true] %s412_s27 }
  0xab   : > { %s3040_s22 = sand.u32 1, %s2387_s19   ;;  %s2245_s3 = scalar_lea.hbm %s2723_s20, 128 }
  0xac   : > { %s401_s1 = scalar_lea.sflag [#allocation5], %s3040_s22  ;;  %p2246_p2 = scmp.ne.s32.totalorder %s2723_s20, %s2245_s3 }
  0xad   : > { %p3041_p3 = scmp.ne.s32.totalorder %s3035_s21, 0  ;;  %s2250_s26 = scalar_lea.hbm %s2973_s0, 256 }
  0xae   : > { %p2251_p12 = scmp.lt.u32.totalorder %s2723_s20, %s2973_s0  ;;  %p2252_p8 = scmp.lt.u32.totalorder %s2250_s26, %s2245_s3 }
  0xaf   : > { %p2248_p1 = pnand %p2246_p2, %p3041_p3  ;;  %p2254_p5 = scmp.lt.u32.totalorder %s2245_s3, %s2723_s20 }
  0xb0   : > { %p2253_p9 = por %p2252_p8, %p2251_p12 }
  0xb1   : > { %p2249_p6 = pneg %p2248_p1 }
  0xb2   : > { %p2255_p11 = por %p2254_p5, %p2253_p9 }
  0xb4   : > { %p2256_p7 = pnand %p2255_p11, %p2249_p6 }
  0xb6   : > { %2259 = shalt.err (!%p2256_p7)
}
  0xb7   : > { %s2260_s10 = scalar_lea.vmem %s2726_s27, 128  ;;  %s2408_s28 = smov [#allocation4]  }
  0xb8   : > { %p2261_p0 = scmp.ne.s32.totalorder %s2726_s27, %s2260_s10  ;;  %s2265_s7 = sshll.u32 %s2408_s28, 4  ;;  %s2266_s7 = int_to_ptr.vmem [resolvable:$false] %s2265_s7 }
  0xb9   : > { %s2267_s13 = scalar_lea.vmem %s2266_s7, 256  ;;  %p2268_p13 = scmp.lt.s32.totalorder %s2726_s27, %s2266_s7 }
  0xba   : > { %p2263_p4 = pnand %p2261_p0, %p3041_p3  ;;  %p2269_p2 = scmp.lt.s32.totalorder %s2267_s13, %s2260_s10 }
  0xbc   : > { %p2264_p10 = pneg %p2263_p4  ;;  %p2270_p1 = por %p2269_p2, %p2268_p13 }
  0xbe   : > { %p2271_p12 = pnand %p2270_p1, %p2264_p10 }
  0xc0   : > { %2274 = shalt.err (!%p2271_p12)
}
  0xc1   : > { %p3042_p6 = scmp.ne.s32.totalorder %s3033_s12, 0  ;;  %s441_s14 = scalar_lea.vmem [#allocation9], %s2632_s29 }
  0xc2   : > { %s448_s22 = sshll.u32 %s441_s14, 4  ;;  %s2275_s3 = scalar_lea.hbm %s2732_s11, 128  ;;  %s449_s22 = int_to_ptr.vmem [resolvable:$true] %s448_s22 }
  0xc3   : > { %2003 = dma.hbm_to_vmem [thread:$0]  (!%p3042_p6), %s2723_s20, 128, %s2726_s27, %s401_s1  }
  0xc4   : > { %p2276_p8 = scmp.ne.s32.totalorder %s2732_s11, %s2275_s3  ;;  %s2280_s26 = scalar_lea.hbm %s2975_s2, 256 }
  0xc5   : > { %p2281_p11 = scmp.lt.u32.totalorder %s2732_s11, %s2975_s2  ;;  %p2282_p7 = scmp.lt.u32.totalorder %s2280_s26, %s2275_s3 }
  0xc6   : > { %p2278_p9 = pnand %p2276_p8, %p3041_p3  ;;  %p2284_p4 = scmp.lt.u32.totalorder %s2275_s3, %s2732_s11 }
  0xc7   : > { %p2283_p0 = por %p2282_p7, %p2281_p11 }
  0xc8   : > { %p2279_p5 = pneg %p2278_p9 }
  0xc9   : > { %p2285_p10 = por %p2284_p4, %p2283_p0 }
  0xcb   : > { %p2286_p13 = pnand %p2285_p10, %p2279_p5 }
  0xcd   : > { %2289 = shalt.err (!%p2286_p13)
}
  0xce   : > { %s2290_s29 = scalar_lea.vmem %s449_s22, 128  ;;  %s2409_s20 = smov [#allocation9]  }
  0xcf   : > { %p2291_p2 = scmp.ne.s32.totalorder %s449_s22, %s2290_s29  ;;  %s2295_s27 = sshll.u32 %s2409_s20, 4  ;;  %s2296_s27 = int_to_ptr.vmem [resolvable:$false] %s2295_s27 }
  0xd0   : > { %s2297_s1 = scalar_lea.vmem %s2296_s27, 256  ;;  %p2298_p8 = scmp.lt.s32.totalorder %s449_s22, %s2296_s27 }
  0xd1   : > { %p2293_p1 = pnand %p2291_p2, %p3041_p3  ;;  %p2299_p9 = scmp.lt.s32.totalorder %s2297_s1, %s2290_s29 }
  0xd3   : > { %p2294_p12 = pneg %p2293_p1  ;;  %p2300_p6 = por %p2299_p9, %p2298_p8 }
  0xd5   : > { %p2301_p7 = pnand %p2300_p6, %p2294_p12 }
  0xd7   : > { %2304 = shalt.err (!%p2301_p7)
}
  0xd8   : > { %p3043_p11 = scmp.ne.s32.totalorder %s3033_s12, 0  ;;  %p3044_p5 = scmp.ne.s32.totalorder %s3020_s24, 0 }
  0xd9   : > { %s2779_s21 = sand.u32 (!%p3044_p5), 1, %s2383_s18   ;;  %p3045_p3 = scmp.ne.s32.totalorder (!%p3044_p5), %s3027_s25, 0 }
  0xda   : > { %2009 = dma.hbm_to_vmem [thread:$0]  (!%p3043_p11), %s2732_s11, 128, %s449_s22, %s2650_s15  }
  0xdb   : > { %457 = sbr.rel (%p3044_p5) target bundleno = 1679 (0x68f), region = 64  ;;  %s2782_s10 = sshll.u32 (!%p3044_p5), %s2779_s21, 3 }
  0xdc   : > { %s460_s28 = scalar_lea.sflag (!%p3044_p5), [#allocation5], %s2779_s21  ;;  %s463_s7 = scalar_lea.vmem (!%p3044_p5), [#allocation4], %s2782_s10 }
  0xe2   : > { %2358 = dma.done.wait (%p3045_p3), %s460_s28, 128  }
  0xe3   : > { %2360 = vsyncadd (%p3045_p3), %s460_s28, 4294967168  ;;  %s468_s24 = sand.u32 1, %s2511_s23   ;;  %s472_s15 = scalar_lea.vmem [#allocation7], %s2782_s10 }
  0xe4   : > { %s469_s12 = scalar_lea.sflag [#allocation8], %s468_s24 }
  0xe5   : > { %2362 = dma.done.wait (%p3045_p3), %s469_s12, 256  }
  0xe6   : > { %2364 = vsyncadd (%p3045_p3), %s469_s12, 4294967040  ;;  %s481_s11 = scalar_lea.vmem [#allocation9], %s2782_s10  ;;  %p3046_p6 = scmp.eq.s32.totalorder %s2511_s23, 0 }
  0xe8   : > { %2366 = dma.done.wait (%p3046_p6), [#allocation11], 1024   ;;  %p3047_p0 = pmov %p3046_p6 }
  0xea   : > { %2368 = vsyncadd (%p3047_p0), [#allocation11], 4294966272  ;;  %p3048_p4 = pmov %p3047_p0 }
  0xeb   : > { %p3049_p10 = pmov %p3047_p0 }
  0xec   : > { %2370 = dma.done.wait (%p3048_p4), [#allocation14], 528  }
  0xed   : > { %2372 = vsyncadd (%p3049_p10), [#allocation14], 4294966768  ;;  %v2410_v0 = vmov 0.0|0.0   ;;  %vm2411_vm0 = vmmov 0   ;;  %v2412_v1 = vmov 0.0   ;;  %v552_v2 = vld [vmem:[#allocation12] sm:$0xff] }
  0xee   : > { %1939 = vmatprep.subr.bf16.mxu0 %v2410_v0  ;;  %1863 = vmatprep.mubr.msk.f32.mxu0 %vm2411_vm0, %v2412_v1  ;;  %v553_v3 = vld [vmem:[#allocation12 + $0x8] sm:$0xff]  ;;  %v554_v4 = vld [vmem:[#allocation12 + $0x10] sm:$0xff]  ;;  %v555_v6 = vld [vmem:[#allocation12 + $0x18] sm:$0xff]  ;;  %vm563_vm1 = vcmask 261120   ;;  %vm721_vm2 = vcmask 64512   ;;  %s2413_s13 = smov 104  }
  0xef   : > { %1945 = vmatprep.subr.bf16.mxu1 %v2410_v0  ;;  %1874 = vmatprep.mubr.msk.f32.mxu1 %vm2411_vm0, %v2412_v1  ;;  %v1940_v5 = vpack.c.bf16 %v553_v3, %v552_v2  ;;  %v1943_v7 = vpack.c.bf16 %v555_v6, %v554_v4  ;;  %v637_v8 = vld [vmem:[#allocation13] sm:$0xff]  ;;  %v638_v9 = vld [vmem:[#allocation13 + $0x8] sm:$0xff]  ;;  %v759_v15 = vld [vmem:[#allocation10 + $0x10] sm:$0xff]  ;;  %s2414_s14 = smov 120   ;;  %s2415_s17 = smov 112   ;;  %vm1507_vm3 = vcmask 130048  }
  0xf0   : > { %v757_v10 = vld [vmem:[#allocation10] sm:$0xff]  ;;  %v758_v11 = vld [vmem:[#allocation10 + $0x8] sm:$0xff]  ;;  %v1946_v12 = vpack.c.bf16 %v638_v9, %v637_v8  ;;  %v760_v16 = vld [vmem:[#allocation10 + $0x18] sm:$0xff]  ;;  %s3050_s9 = sld [smem:[#allocation33_spill]]  ;;  %s2417_s24 = smov 24   ;;  %vm1509_vm4 = vcmask 195584  }
  0xf1   : > { %1941 = vmatpush3.bf16.msra.mxu0 %v1940_v5  ;;  %v550_v13 = vld [vmem:[%s472_s15] sm:$0xff]  ;;  %v1952_v14 = vpack.c.bf16 %v758_v11, %v757_v10  ;;  %v1955_v17 = vpack.c.bf16 %v760_v16, %v759_v15  ;;  %v756_v18 = vld [vmem:[%s463_s7] sm:$0xff]  ;;  %s2416_s7 = smov 8   ;;  %s3051_s12 = sld [smem:[#allocation23_spill]] }
  0xf2   : > { %1942 = vmatprep.subr.bf16.mxu0 %v2410_v0  ;;  %1947 = vmatpush3.bf16.msra.mxu1 %v1946_v12  ;;  %v639_v19 = vld [vmem:[#allocation13 + $0x10] sm:$0xff]  ;;  %v640_v20 = vld [vmem:[#allocation13 + $0x18] sm:$0xff]  ;;  %v1797_v32 = vld [vmem:[#allocation15] ss:$0 sm:$0xff]  ;;  %s2418_s15 = smov 16   ;;  %s545_s22 = scalar_lea.vmem [#allocation16], %s2782_s10 }
  0xf3   : > { %1948 = vmatprep.subr.bf16.mxu1 %v2410_v0  ;;  %v1949_v21 = vpack.c.bf16 %v640_v20, %v639_v19  ;;  %v551_v22 = vld [vmem:[%s481_s11] sm:$0xff]  ;;  %s3052_s11 = sld [smem:[#allocation27_spill]]  ;;  %s1611_s3 = sshll.u32 %s545_s22, 4  ;;  %s2925_s3 = int_to_ptr.vmem [resolvable:$true] %s1611_s3 }
  0xf4   : > { %v1795_v23 = vld [vmem:[%s2979_s6] ss:$0 sm:$0xff]  ;;  %s3054_s26 = sld [smem:[#allocation35_spill]]  ;;  %s1597_s29 = scalar_lea.sflag [#allocation6], %s2779_s21 }
  0xf5   : > { %1944 = vmatpush3.bf16.msra.mxu0 %v1943_v7  ;;  %v1799_v27 = vld [vmem:[%s2977_s4] ss:$0 sm:$0xff]  ;;  %s2305_s20 = scalar_lea.vmem %s2925_s3, 128  ;;  %s2419_s10 = smov [#allocation16]  }
  0xf6   : > { %1951 = vmatprep.subr.bf16.mxu0 %v2410_v0  ;;  %1950 = vmatpush3.bf16.msra.mxu1 %v1949_v21  ;;  %p2306_p13 = scmp.ne.s32.totalorder %s2925_s3, %s2305_s20  ;;  %s2309_s27 = sshll.u32 %s2419_s10, 4  ;;  %s2310_s27 = int_to_ptr.vmem [resolvable:$false] %s2309_s27 }
  0xf7   : > { %1888 = vmatprep.subr.mxu1 %v2412_v1  ;;  %s2311_s1 = scalar_lea.vmem %s2310_s27, 256  ;;  %p2312_p8 = scmp.lt.s32.totalorder %s2925_s3, %s2310_s27 }
  0xf8   : > { %1864 = vmatmul.mubr.msk.f32.vlgmr.msra.gmra.mrb[0].mxu0 %vm563_vm1, %v550_v13  ;;  %p2313_p9 = scmp.lt.s32.totalorder %s2311_s1, %s2305_s20 }
  0xf9   : > { %1953 = vmatpush3.bf16.msra.mxu0 %v1952_v14  ;;  %1885 = vmatprep.mubr.msk.f32.mxu0 %vm2411_vm0, %v2412_v1  ;;  %p3055_p2 = scmp.ne.s32.totalorder %s3052_s11, 0 }
  0xfa   : > { %1954 = vmatprep.subr.bf16.mxu0 %v2410_v0  ;;  %1875 = vmatmul.mubr.msk.f32.vlgmr.msra.gmra.mrb[0].mxu1 %vm563_vm1, %v551_v22  ;;  %p2314_p7 = por %p2313_p9, %p2312_p8 }
  0xfb   : > { %1890 = vmatprep.mubr.msk.f32.mxu1 %vm2411_vm0, %v2412_v1  ;;  %p2307_p1 = pnand %p2306_p13, %p3055_p2 }
  0xfd   : > { %1956 = vmatpush3.bf16.msra.mxu0 %v1955_v17  ;;  %p2308_p12 = pneg %p2307_p1 }
  0xfe   : > { %1908 = vmatprep.subr.mxu0 %v2412_v1 }
  0xff   : > { %p2315_p11 = pnand %p2314_p7, %p2308_p12 }
 0x100   : > { %1886 = vmatmul.mubr.msk.f32.vlgmr.msra.gmra.mrb[2].mxu0 %vm563_vm1, %v756_v18 }
 0x101   : > { %1910 = vmatprep.mubr.msk.f32.mxu0 %vm2411_vm0, %v2412_v1 }
 0x1cb   : > { %v633_v24 = vpop.f32.mrb[0].mxu0 }
 0x1cc   : > { %v634_v25 = vadd.f32 %v1795_v23, %v633_v24  ;;  %v1865_v26 = vpop.f32.mrb[1].mxu0 }
 0x1cd   : > { %v717_v33 = vpop.f32.mrb[0].mxu1 }
 0x1ce   : > { %722 = vst.msk [vmem:[#allocation2] sm:$0xff] %vm721_vm2, %v634_v25  ;;  %746 = vrot.lane.b32.xlu1 %v634_v25, %s2413_s13  ;;  %725 = vrot.lane.b32.xlu0 %v634_v25, %s2414_s14  ;;  %v2848_v34 = vadd.f32 %v1797_v32, %v717_v33  ;;  %v1876_v35 = vpop.f32.mrb[1].mxu1 }
 0x1d0   : > { %723 = vst.msk [vmem:[#allocation3] sm:$0xff] %vm721_vm2, %v2848_v34 }
 0x1d2   : > { %736 = vrot.lane.b32.xlu0 %v634_v25, %s2415_s17 }
 0x1d3   : > { %v838_v28 = vpop.f32.mrb[2].mxu0 }
 0x1d4   : > { %v839_v29 = vadd.f32 %v1799_v27, %v838_v28  ;;  %v1887_v30 = vpop.f32.mrb[3].mxu0 }
 0x1d5   : > { %v849_v31 = vld [vmem:[#allocation2] sm:$0xff] }
 0x1d6   : > { %1889 = vmatpush3.xpose.msk.msra.mxu1 %vm721_vm2, %v849_v31  ;;  %843 = vrot.lane.b32.xlu1 %v839_v29, %s2414_s14 }
 0x1d7   : > { %845 = vrot.lane.b32.xlu0 %v839_v29, %s2415_s17  ;;  %1893 = vmatprep.subr.mxu1 %v2412_v1  ;;  %v1198_v45 = vld [vmem:[#allocation3] sm:$0xff] }
 0x1d8   : > { %1909 = vmatpush3.msra.mxu0 %v1198_v45 }
 0x1d9   : > { %1891 = vmatmul.mubr.msk.f32.vlgmr.msra.gmra.mrb[2].mxu1 %vm721_vm2, %v839_v29  ;;  %1918 = vmatprep.subr.mxu0 %v2412_v1 }
 0x1da   : > { %847 = vrot.lane.b32.xlu1 %v839_v29, %s2413_s13  ;;  %1895 = vmatprep.mubr.msk.f32.mxu1 %vm2411_vm0, %v2412_v1 }
 0x240   : > { %v747_v36 = vpop.permute.xlu1 %746  ;;  %v726_v37 = vpop.permute.xlu0 %725 }
 0x241   : > { %750 = vst.msk [vmem:[#allocation2 + $0x18] sm:$0xff] %vm721_vm2, %v747_v36  ;;  %729 = vst.msk [vmem:[#allocation2 + $0x8] sm:$0xff] %vm721_vm2, %v726_v37  ;;  %v1511_v36 = vld [vmem:[%s3050_s9] sm:$0xff]  ;;  %v1512_v37 = vld [vmem:[%s3050_s9 + $0x8] sm:$0xff] }
 0x244   : > { %v737_v38 = vpop.permute.xlu0 %736 }
 0x245   : > { %740 = vst.msk [vmem:[#allocation2 + $0x10] sm:$0xff] %vm721_vm2, %v737_v38  ;;  %v1513_v38 = vld [vmem:[%s3050_s9 + $0x10] sm:$0xff] }
 0x248   : > { %v850_v39 = vld [vmem:[#allocation2 + $0x8] sm:$0xff]  ;;  %v844_v40 = vpop.permute.xlu1 %843  ;;  %v852_v43 = vld [vmem:[#allocation2 + $0x18] sm:$0xff] }
 0x249   : > { %1894 = vmatpush3.xpose.msk.msra.mxu1 %vm721_vm2, %v850_v39  ;;  %v846_v42 = vpop.permute.xlu0 %845  ;;  %v1958_v39 = vpack.c.bf16 %v1512_v37, %v1511_v36 }
 0x24a   : > { %1898 = vmatprep.subr.mxu1 %v2412_v1 }
 0x24c   : > { %1896 = vmatmul.mubr.msk.f32.vlgmr.msra.gmra.mrb[4].mxu1 %vm721_vm2, %v844_v40  ;;  %v851_v41 = vld [vmem:[#allocation2 + $0x10] sm:$0xff]  ;;  %v848_v44 = vpop.permute.xlu1 %847  ;;  %v1514_v40 = vld [vmem:[%s3050_s9 + $0x18] sm:$0xff] }
 0x24d   : > { %1899 = vmatpush3.xpose.msk.msra.mxu1 %vm721_vm2, %v851_v41  ;;  %1900 = vmatprep.mubr.msk.f32.mxu1 %vm2411_vm0, %v2412_v1 }
 0x24e   : > { %1903 = vmatprep.subr.mxu1 %v2412_v1 }
 0x250   : > { %1901 = vmatmul.mubr.msk.f32.vlgmr.msra.gmra.mrb[6].mxu1 %vm721_vm2, %v846_v42 }
 0x251   : > { %1904 = vmatpush3.xpose.msk.msra.mxu1 %vm721_vm2, %v852_v43  ;;  %1905 = vmatprep.mubr.msk.f32.mxu1 %vm2411_vm0, %v2412_v1 }
 0x252   : > { %1913 = vmatprep.subr.mxu1 %v2412_v1 }
 0x254   : > { %1906 = vmatmul.mubr.msk.f32.vlgmr.msra.gmra.mrb[8].mxu1 %vm721_vm2, %v848_v44 }
 0x255   : > { %1915 = vmatprep.mubr.msk.f32.mxu1 %vm2411_vm0, %v2412_v1 }
 0x2ac   : > { %v925_v46 = vpop.f32.mrb[2].mxu1 }
 0x2ad   : > { %v1892_v47 = vpop.f32.mrb[3].mxu1  ;;  %v1154_v48 = vsel %vm721_vm2, %v925_v46, -inf }
 0x2ae   : > { %1155 = vmax.xlane.f32.xlu0 %v1154_v48 }
 0x31f   : > { %v1000_v49 = vpop.f32.mrb[4].mxu1 }
 0x320   : > { %v1897_v50 = vpop.f32.mrb[5].mxu1  ;;  %v1157_v51 = vsel %vm721_vm2, %v1000_v49, -inf }
 0x321   : > { %1158 = vmax.xlane.f32.xlu1 %v1157_v51 }
 0x323   : > { %v1075_v52 = vpop.f32.mrb[6].mxu1 }
 0x324   : > { %v1902_v53 = vpop.f32.mrb[7].mxu1  ;;  %v1160_v54 = vsel %vm721_vm2, %v1075_v52, -inf }
 0x325   : > { %1161 = vmax.xlane.f32.xlu0 %v1160_v54 }
 0x327   : > { %v1150_v55 = vpop.f32.mrb[8].mxu1 }
 0x328   : > { %v1907_v56 = vpop.f32.mrb[9].mxu1  ;;  %v1163_v57 = vsel %vm721_vm2, %v1150_v55, -inf }
 0x329   : > { %1164 = vmax.xlane.f32.xlu0 %v1163_v57 }
 0x332   : > { %731 = vrot.lane.b32.xlu1 %v2848_v34, %s2414_s14  ;;  %s1816_s14 = sshll.u32 %s3051_s12, 7 }
 0x333   : > { %s2923_s16 = scalar_lea.hbm %s3054_s26, %s1816_s14 }
 0x33b   : > { %v1156_v58 = vpop.xlane.xlu0 %1155 }
 0x33c   : > { %v1166_v59 = vsub.f32 %v925_v46, %v1156_v58 }
 0x33e   : > { %v1170_v60 = vmul.f32 1.442695, %v1166_v59 }
 0x340   : > { %2087 = vpow2.f32 %v1170_v60 }
 0x34a   : > { %v2088_v61 = vpop.eup %2087 }
 0x34b   : > { %v1178_v62 = vsel %vm721_vm2, %v2088_v61, 0.0 }
 0x356   : > { %1179 = vadd.xlane.f32.xlu1 %v1178_v62 }
 0x3ae   : > { %v1159_v63 = vpop.xlane.xlu1 %1158 }
 0x3af   : > { %v1167_v2 = vsub.f32 %v1000_v49, %v1159_v63 }
 0x3b1   : > { %v1172_v3 = vmul.f32 1.442695, %v1167_v2 }
 0x3b2   : > { %v732_v4 = vpop.permute.xlu1 %731  ;;  %v1162_v5 = vpop.xlane.xlu0 %1161 }
 0x3b3   : > { %2089 = vpow2.f32 %v1172_v3  ;;  %735 = vst.msk [vmem:[#allocation3 + $0x8] sm:$0xff] %vm721_vm2, %v732_v4  ;;  %v1168_v6 = vsub.f32 %v1075_v52, %v1162_v5 }
 0x3b5   : > { %v1174_v7 = vmul.f32 1.442695, %v1168_v6 }
 0x3b6   : > { %v1165_v8 = vpop.xlane.xlu0 %1164 }
 0x3b7   : > { %2091 = vpow2.f32 %v1174_v7  ;;  %v1169_v9 = vsub.f32 %v1150_v55, %v1165_v8 }
 0x3b9   : > { %v1176_v10 = vmul.f32 1.442695, %v1169_v9 }
 0x3ba   : > { %v1199_v11 = vld [vmem:[#allocation3 + $0x8] sm:$0xff] }
 0x3bb   : > { %2093 = vpow2.f32 %v1176_v10  ;;  %1914 = vmatpush3.msra.mxu1 %v1199_v11 }
 0x3bc   : > { %1923 = vmatprep.subr.mxu1 %v2412_v1 }
 0x3bd   : > { %v2090_v12 = vpop.eup %2089 }
 0x3be   : > { %v1181_v13 = vsel %vm721_vm2, %v2090_v12, 0.0 }
 0x3bf   : > { %1182 = vadd.xlane.f32.xlu0 %v1181_v13 }
 0x3c1   : > { %v2092_v14 = vpop.eup %2091 }
 0x3c2   : > { %v1184_v15 = vsel %vm721_vm2, %v2092_v14, 0.0 }
 0x3c3   : > { %1185 = vadd.xlane.f32.xlu1 %v1184_v15 }
 0x3c5   : > { %v2094_v16 = vpop.eup %2093 }
 0x3c6   : > { %v1187_v17 = vsel %vm721_vm2, %v2094_v16, 0.0 }
 0x3c7   : > { %1188 = vadd.xlane.f32.xlu0 %v1187_v17 }
 0x3d4   : > { %751 = vrot.lane.b32.xlu1 %v2848_v34, %s2413_s13  ;;  %s3053_s13 = sld [smem:[#allocation34_spill]] }
 0x3da   : > { %v1813_v52 = vld [vmem:[%s3053_s13] ss:$0 sm:$0xff] }
 0x3dd   : > { %741 = vrot.lane.b32.xlu0 %v2848_v34, %s2415_s17 }
 0x3e3   : > { %v1180_v18 = vpop.xlane.xlu1 %1179 }
 0x3e4   : > { %2095 = vrcp.f32 %v1180_v18 }
 0x3ee   : > { %v2096_v19 = vpop.eup %2095 }
 0x3ef   : > { %v1194_v20 = vmul.f32 %v2096_v19, %v2088_v61 }
 0x3f1   : > { %1911 = vmatmul.mubr.msk.f32.vlgmr.msra.gmra.mrb[4].mxu0 %vm721_vm2, %v1194_v20 }
 0x3f2   : > { %1920 = vmatprep.mubr.msk.f32.mxu0 %vm2411_vm0, %v2412_v1 }
 0x44c   : > { %v1183_v21 = vpop.xlane.xlu0 %1182 }
 0x44d   : > { %2097 = vrcp.f32 %v1183_v21 }
 0x450   : > { %v1186_v22 = vpop.xlane.xlu1 %1185 }
 0x451   : > { %2099 = vrcp.f32 %v1186_v22 }
 0x454   : > { %v752_v23 = vpop.permute.xlu1 %751  ;;  %v1189_v24 = vpop.xlane.xlu0 %1188 }
 0x455   : > { %755 = vst.msk [vmem:[#allocation3 + $0x18] sm:$0xff] %vm721_vm2, %v752_v23  ;;  %2101 = vrcp.f32 %v1189_v24 }
 0x457   : > { %v2098_v25 = vpop.eup %2097 }
 0x458   : > { %v1195_v26 = vmul.f32 %v2098_v25, %v2090_v12  ;;  %v742_v27 = vpop.permute.xlu0 %741 }
 0x459   : > { %745 = vst.msk [vmem:[#allocation3 + $0x10] sm:$0xff] %vm721_vm2, %v742_v27 }
 0x45a   : > { %1916 = vmatmul.mubr.msk.f32.vlgmr.msra.gmra.mrb[10].mxu1 %vm721_vm2, %v1195_v26 }
 0x45b   : > { %1925 = vmatprep.mubr.msk.f32.mxu1 %vm2411_vm0, %v2412_v1  ;;  %v2100_v29 = vpop.eup %2099 }
 0x45c   : > { %v1201_v28 = vld [vmem:[#allocation3 + $0x18] sm:$0xff]  ;;  %v1196_v31 = vmul.f32 %v2100_v29, %v2092_v14 }
 0x45d   : > { %1924 = vmatpush3.msra.mxu1 %v1201_v28 }
 0x45f   : > { %v2102_v30 = vpop.eup %2101 }
 0x460   : > { %v1197_v32 = vmul.f32 %v2102_v30, %v2094_v16  ;;  %v1200_v33 = vld [vmem:[#allocation3 + $0x10] sm:$0xff] }
 0x461   : > { %1919 = vmatpush3.msra.mxu0 %v1200_v33 }
 0x462   : > { %1921 = vmatmul.mubr.msk.f32.vlgmr.msra.gmra.mrb[6].mxu0 %vm721_vm2, %v1196_v31  ;;  %1926 = vmatmul.mubr.msk.f32.vlgmr.msra.gmra.mrb[12].mxu1 %vm721_vm2, %v1197_v32 }
 0x463   : > { %1957 = vmatprep.subr.bf16.mxu0 %v2410_v0  ;;  %1936 = vmatprep.mubr.msk.f32.mxu0 %vm2411_vm0, %v2412_v1  ;;  %v1961_v1 = vpack.c.bf16 %v1514_v40, %v1513_v38 }
 0x464   : > { %1959 = vmatpush3.bf16.msra.mxu0 %v1958_v39 }
 0x465   : > { %1960 = vmatprep.subr.bf16.mxu0 %v2410_v0 }
 0x468   : > { %1962 = vmatpush3.bf16.msra.mxu0 %v1961_v1 }
 0x4c4   : > { %v1271_v34 = vpop.f32.mrb[4].mxu0 }
 0x4c5   : > { %v1912_v35 = vpop.f32.mrb[5].mxu0 }
 0x52d   : > { %v1344_v41 = vpop.f32.mrb[10].mxu1 }
 0x52e   : > { %1495 = vrot.lane.b32.xlu1 %v1344_v41, %s2416_s7  ;;  %v1917_v42 = vpop.f32.mrb[11].mxu1 }
 0x535   : > { %v1417_v43 = vpop.f32.mrb[6].mxu0  ;;  %v1490_v44 = vpop.f32.mrb[12].mxu1 }
 0x536   : > { %1503 = vrot.lane.b32.xlu1 %v1490_v44, %s2417_s24  ;;  %v1927_v45 = vpop.f32.mrb[13].mxu1  ;;  %1499 = vrot.lane.b32.xlu0 %v1417_v43, %s2418_s15  ;;  %v1922_v46 = vpop.f32.mrb[7].mxu0 }
 0x5a0   : > { %v1496_v47 = vpop.permute.xlu1 %1495 }
 0x5a1   : > { %v1506_v0 = vsel %vm721_vm2, %v1271_v34, %v1496_v47 }
 0x5a8   : > { %v1504_v48 = vpop.permute.xlu1 %1503  ;;  %v1500_v49 = vpop.permute.xlu0 %1499 }
 0x5a9   : > { %v1508_v50 = vsel %vm1507_vm3, %v1506_v0, %v1500_v49 }
 0x5aa   : > { %v1510_v51 = vsel %vm1509_vm4, %v1508_v50, %v1504_v48 }
 0x5ab   : > { %1937 = vmatmul.mubr.msk.f32.vlgmr.msra.gmra.mrb[8].mxu0 %vm563_vm1, %v1510_v51 }
 0x67e   : > { %v1591_v53 = vpop.f32.mrb[8].mxu0 }
 0x67f   : > { %v1592_v54 = vadd.f32 %v1813_v52, %v1591_v53  ;;  %v1938_v55 = vpop.f32.mrb[9].mxu0 }
 0x681   : > { %1595 = vst.msk [vmem:[%s545_s22] sm:$0xff] %vm563_vm1, %v1592_v54 }
 0x682   : > { %2318 = shalt.err (!%p2315_p11)
}
 0x683   : > { %s2319_s21 = scalar_lea.hbm %s2923_s16, 128  ;;  %s2323_s24 = scalar_lea.hbm %s3054_s26, 256 }
 0x684   : > { %p2320_p5 = scmp.ne.s32.totalorder %s2923_s16, %s2319_s21  ;;  %p2324_p0 = scmp.lt.u32.totalorder %s2923_s16, %s3054_s26 }
 0x685   : > { %p2325_p4 = scmp.lt.u32.totalorder %s2323_s24, %s2319_s21  ;;  %p2327_p13 = scmp.lt.u32.totalorder %s2319_s21, %s2923_s16 }
 0x686   : > { %p2321_p3 = pnand %p2320_p5, %p3055_p2 }
 0x687   : > { %p2326_p10 = por %p2325_p4, %p2324_p0 }
 0x688   : > { %p2322_p6 = pneg %p2321_p3 }
 0x689   : > { %p2328_p1 = por %p2327_p13, %p2326_p10 }
 0x68b   : > { %p2329_p12 = pnand %p2328_p1, %p2322_p6 }
 0x68d   : > { %2332 = shalt.err (!%p2329_p12)
}
 0x68e   : > { %1985 = dma.vmem_to_hbm [thread:$0]  (%p3055_p2), %s2925_s3, 128, %s2923_s16, %s1597_s29  }
 0x68f PF: > { %s3056_s23 = sld [smem:[#allocation22_spill]]  ;;  %s3057_s25 = sld [smem:[#allocation29_spill]] }
 0x690   : > { %s3058_s13 = sld [smem:[#allocation25_spill]] }
 0x695   : > { %s1623_s14 = sand.u32 1, %s3056_s23   ;;  %p3059_p8 = scmp.ne.s32.totalorder %s3057_s25, 0 }
 0x696   : > { %p3060_p9 = scmp.ge.s32.totalorder %s3058_s13, 2  ;;  %s1624_s22 = scalar_lea.sflag [#allocation6], %s1623_s14 }
 0x698   : > { %p2011_p7 = pnand %p3060_p9, %p3059_p8 }
 0x69a   : > { %2374 = dma.done.wait (!%p2011_p7), %s1624_s22, 128  }
 0x69b   : > { %2376 = vsyncadd (!%p2011_p7), %s1624_s22, 4294967168  ;;  %s32_s22 = sadd.s32 1, %s3058_s13   ;;  %s3061_s11 = sld [smem:[#allocation28_spill]] }
 0x69c   : > { %p29_p11 = scmp.ge.s32.totalorder %s32_s22, 4   ;;  %s3062_s20 = sld [smem:[#allocation24_spill]] }
 0x69d   : > { %s3063_s21 = sld [smem:[#allocation26_spill]]  ;;  %s3064_s17 = smov %s2383_s18 }
 0x69e   : > { %s3065_s18 = smov %s2387_s19  ;;  %31 = sbr.rel (!%p29_p11) target bundleno = 17 (0x11), region = 159 }
 0x6a1   : > { %s3066_s19 = smov %s3061_s11 }
 0x6a5   :  { %1629 = vsyncpa [#allocation5], 1 }
 0x6a6   :  { %1631 = vsyncpa [#allocation5 + $0x1], 1 }
 0x6a7   :  { %1632 = vsyncpa [#allocation8], 1 }
 0x6a8   :  { %1634 = vsyncpa [#allocation8 + $0x1], 1 }
 0x6a9   :  { %1635 = vsyncpa [#allocation11], 1 }
 0x6aa   :  { %1636 = vsyncpa [#allocation14], 1 }
 0x6ab   :  { %1637 = vsyncpa [#allocation6], 1 }
 0x6ac   :  { %1639 = vsyncpa [#allocation6 + $0x1], 1 }

</bundles_post_ra>
